<compile_context>
chip_gen: v5e
topology: v5e:2x2
jax: 0.10.0
libtpu: 0.0.40
codegen_flags: <defaults>
</compile_context>

<pallas_src>
import functools

import jax
import jax.numpy as jnp
from jax.experimental import pallas as pl
from jax.experimental.pallas import tpu as pltpu


# --------------------------------------------------------------------------- #
# Kernel bodies
# --------------------------------------------------------------------------- #
def _assemble_and_score(enc_head, t0, t1, femb_ref, out_ref, cat_ref,
                        init_femb_once):
    """Build cat = [field_emb ; enc_head] in the VMEM scratch and emit both
    label scores as full-block stores."""
    bt, s, h = enc_head.shape
    f = femb_ref.shape[0]

    def write_femb():
        cat_ref[:, :f, :] = jnp.broadcast_to(femb_ref[...], (bt, f, h))

    if init_femb_once:
        # Scratch persists across grid iterations and femb is grid-invariant:
        # fill its rows only on the first step (grid runs sequentially here).
        @pl.when(pl.program_id(0) == 0)
        def _():
            write_femb()
    else:
        # Grid may be sharded across v7x TensorCores ("parallel"); each core
        # has a private scratch and only one core ever sees program_id == 0,
        # so write the (small) femb rows every step for correctness.
        write_femb()

    # NOTE: if F is not a multiple of the compute-dtype sublane pack this store
    # starts at an unaligned sublane offset; padding F would force an extra
    # full-output copy in the wrapper (worse on the v5e store-bound roofline),
    # so we accept the retiled scratch store instead.
    cat_ref[:, f:, :] = enc_head
    cat = cat_ref[...]                                     # (bt, F+S, H)

    # 'bqh,bkh->bqk' : contract H, batch over bt.
    dn_score = (((2,), (2,)), ((0,), (0,)))
    out_ref[:, 0, :, :] = jax.lax.dot_general(
        cat, t0, dn_score, preferred_element_type=jnp.float32
    ).astype(out_ref.dtype)
    out_ref[:, 1, :, :] = jax.lax.dot_general(
        cat, t1, dn_score, preferred_element_type=jnp.float32
    ).astype(out_ref.dtype)


def _kernel_fused(enc_ref, w_ht_ref, b_ht_ref, w_lab_ref, femb_ref,
                  out_ref, cat_ref, *, init_femb_once):
    """H % 128 == 0 path: head|tail and label0|label1 fused into (H, 2H)."""
    bt, s, h = enc_ref.shape
    cdt = enc_ref.dtype
    dn = (((1,), (0,)), ((), ()))                          # contract lhs[-1], rhs[0]

    x = enc_ref[...].reshape(bt * s, h)                    # (bt*S, H)
    ht = jax.lax.dot_general(x, w_ht_ref[...], dn,
                             preferred_element_type=jnp.float32)
    ht = ht + b_ht_ref[...]                                # single f32 bias add
    # H % 128 == 0 -> vreg-granular lane slices (cheap selects, no relayout).
    enc_head = ht[:, :h].astype(cdt).reshape(bt, s, h)
    enc_tail = ht[:, h:].astype(cdt)

    t = jax.lax.dot_general(enc_tail, w_lab_ref[...], dn,
                            preferred_element_type=jnp.float32)
    t = t.astype(cdt).reshape(bt, s, 2 * h)                # columns: [t0 | t1]
    _assemble_and_score(enc_head, t[:, :, :h], t[:, :, h:],
                        femb_ref, out_ref, cat_ref, init_femb_once)


def _kernel_split(enc_ref, w_h_ref, w_t_ref, b_h_ref, b_t_ref,
                  w_l0_ref, w_l1_ref, femb_ref, out_ref, cat_ref,
                  *, init_femb_once):
    """H % 128 != 0 path: separate (H, H) matmuls, no lane-offset slicing."""
    bt, s, h = enc_ref.shape
    cdt = enc_ref.dtype
    dn = (((1,), (0,)), ((), ()))

    x = enc_ref[...].reshape(bt * s, h)                    # (bt*S, H)
    enc_head = (jax.lax.dot_general(x, w_h_ref[...], dn,
                                    preferred_element_type=jnp.float32)
                + b_h_ref[...]).astype(cdt).reshape(bt, s, h)
    enc_tail = (jax.lax.dot_general(x, w_t_ref[...], dn,
                                    preferred_element_type=jnp.float32)
                + b_t_ref[...]).astype(cdt)
    t0 = jax.lax.dot_general(enc_tail, w_l0_ref[...], dn,
                             preferred_element_type=jnp.float32
                             ).astype(cdt).reshape(bt, s, h)
    t1 = jax.lax.dot_general(enc_tail, w_l1_ref[...], dn,
                             preferred_element_type=jnp.float32
                             ).astype(cdt).reshape(bt, s, h)
    _assemble_and_score(enc_head, t0, t1, femb_ref, out_ref, cat_ref,
                        init_femb_once)


# --------------------------------------------------------------------------- #
# Host-side sizing helpers
# --------------------------------------------------------------------------- #
def _tpu_generation():
    try:
        kind = jax.devices()[0].device_kind.lower()
    except Exception:
        return "unknown"
    if "v7" in kind or "7x" in kind:
        return "v7x"
    if "v6" in kind:
        return "v6e"
    if "v5p" in kind:
        return "v5p"
    if "v5" in kind:
        return "v5e"
    if "v4" in kind:
        return "v4"
    return "unknown"


def _vmem_capacity_bytes(gen):
    try:
        info = pltpu.get_tpu_info()
        cap = getattr(info, "vmem_capacity_bytes", None)
        if cap:
            return int(cap)
    except Exception:
        pass
    return (64 if gen == "v7x" else 128) * 1024 * 1024


def _step_vmem_bytes(bt, seq, hidden, n_fields, c_bytes, out_bytes):
    """Approximate per-step VMEM footprint: double-buffered streaming blocks,
    single-buffered weights, cat scratch and f32 intermediates."""
    enc_blk = 2 * bt * seq * hidden * c_bytes                      # enc, 2 bufs
    out_blk = 2 * bt * 2 * (n_fields + seq) * seq * out_bytes      # out, 2 bufs
    weights = 4 * hidden * hidden * c_bytes + 2 * hidden * 4       # W (1 buf) + biases
    femb = n_fields * hidden * c_bytes
    cat = bt * (n_fields + seq) * hidden * c_bytes
    inter = bt * seq * 2 * hidden * (4 + c_bytes)                  # ht/t f32 + casts
    return enc_blk + out_blk + weights + femb + cat + inter


def _pick_batch_tile(batch, seq, hidden, n_fields, c_bytes, out_bytes, gen,
                     vmem_budget):
    """Generation-aware batch tile: >=256 MXU rows on v6e/v7x (256-wide MXU),
    >=128 on v5e-class parts, capped by the VMEM budget; on v7x keep >=2
    (ideally >=4) grid steps so both TensorCores stay pipelined."""
    divisors = [d for d in range(1, batch + 1) if batch % d == 0]
    feasible = [d for d in divisors
                if _step_vmem_bytes(d, seq, hidden, n_fields,
                                    c_bytes, out_bytes) <= vmem_budget]
    if not feasible:
        feasible = [1]
    target_rows = 128 if gen in ("v4", "v5e", "v5p") else 256
    big_enough = [d for d in feasible if d * seq >= target_rows]
    bt = min(big_enough) if big_enough else max(feasible)
    if gen == "v7x":
        for min_steps in (4, 2):
            cands = [d for d in feasible if batch // d >= min_steps]
            if cands:
                bt = max(cands)
                break
    return bt


# --------------------------------------------------------------------------- #
# Public wrapper
# --------------------------------------------------------------------------- #
def relation_tagger(enc, params, *, compute_dtype=jnp.bfloat16,
                    out_dtype=jnp.float32, batch_tile=None,
                    vmem_limit_bytes=None, stream_buffers=None):
    """Pallas forward of RelationTagger. Returns (B, 2, n_fields + S, S).

    compute_dtype=bfloat16 feeds the MXU in bf16 with f32 accumulation — a
    deliberate numerics change vs the f32 PyTorch module (score error grows
    roughly with sqrt(H); pass float32 for module-exact math).  out_dtype can
    be set to bfloat16 to halve the score writeback bytes (v5e roofline) when
    the consumer tolerates it.  stream_buffers>2 deepens pipelining on the
    streaming enc/output blocks if profiling shows exposed DMA.
    """
    B, S, H = enc.shape
    cdt = jnp.dtype(compute_dtype)
    odt = jnp.dtype(out_dtype)

    femb = jnp.asarray(params["field_embeddings"])
    femb = femb.reshape(-1, femb.shape[-1]).astype(cdt)            # (F, H)
    F = femb.shape[0]

    # Normalize PyTorch Linear shapes: weights (out,in) -> (in,out),
    # biases (H,) or (1,H) -> (1,H) f32.
    w_head = jnp.asarray(params["head_w"]).T.astype(cdt)
    w_tail = jnp.asarray(params["tail_w"]).T.astype(cdt)
    b_head = jnp.asarray(params["head_b"]).reshape(1, -1).astype(jnp.float32)
    b_tail = jnp.asarray(params["tail_b"]).reshape(1, -1).astype(jnp.float32)
    w_l0 = jnp.asarray(params["w_label_0"]).T.astype(cdt)
    w_l1 = jnp.asarray(params["w_label_1"]).T.astype(cdt)
    enc_c = enc.astype(cdt)

    gen = _tpu_generation()
    vmem_cap = _vmem_capacity_bytes(gen)
    if vmem_limit_bytes is None:
        # ~56 MiB on v7x (64 MiB part), ~112 MiB on v5e/v6e (128 MiB parts).
        vmem_limit_bytes = (vmem_cap * 7) // 8
    vmem_limit_bytes = int(vmem_limit_bytes)
    tile_budget = int(vmem_limit_bytes * 0.8)       # headroom for Mosaic scratch

    if batch_tile is None:
        bt = _pick_batch_tile(B, S, H, F, cdt.itemsize, odt.itemsize, gen,
                              tile_budget)
    else:
        bt = batch_tile
    assert B % bt == 0, (B, bt)
    num_steps = B // bt
    grid = (num_steps,)

    # "parallel" may shard the grid across v7x's two TensorCores (private
    # scratch per core), so the write-femb-once optimization is only enabled
    # when the grid provably runs sequentially.
    shard_across_cores = (gen == "v7x") and num_steps > 1
    dim_sem = ("parallel",) if shard_across_cores else ("arbitrary",)
    init_femb_once = not shard_across_cores

    fuse = (H % 128 == 0)
    if fuse:
        w_ht = jnp.concatenate([w_head, w_tail], axis=1)           # (H, 2H)
        b_ht = jnp.concatenate([b_head, b_tail], axis=1)           # (1, 2H) f32
        w_lab = jnp.concatenate([w_l0, w_l1], axis=1)              # (H, 2H)
        kernel = functools.partial(_kernel_fused, init_femb_once=init_femb_once)
        weight_args = (w_ht, b_ht, w_lab)
        weight_shapes = [(H, 2 * H), (1, 2 * H), (H, 2 * H)]
    else:
        kernel = functools.partial(_kernel_split, init_femb_once=init_femb_once)
        weight_args = (w_head, w_tail, b_head, b_tail, w_l0, w_l1)
        weight_shapes = [(H, H), (H, H), (1, H), (1, H), (H, H), (H, H)]

    out_shape = jax.ShapeDtypeStruct((B, 2, F + S, S), odt)

    flops = int(B * (2 * S * H * (2 * H)            # head + tail projections
                     + 2 * S * H * (2 * H)          # both label projections
                     + 2 * (F + S) * H * (2 * S)))  # both score matmuls
    bytes_accessed = int(enc_c.size * cdt.itemsize
                         + (4 * H * H + F * H) * cdt.itemsize + 2 * H * 4
                         + B * 2 * (F + S) * S * odt.itemsize)
    cost = pl.CostEstimate(flops=flops, transcendentals=0,
                           bytes_accessed=bytes_accessed)

    def rep(i):                                    # grid-invariant operands
        return (0, 0)

    def build(single_buffer_weights):
        const_kw = ({"pipeline_mode": pl.Buffered(1)}
                    if single_buffer_weights else {})
        stream_kw = ({"pipeline_mode": pl.Buffered(int(stream_buffers))}
                     if stream_buffers is not None else {})
        # TODO(synk): for very large H (>~2048) or very large S, add a grid
        # axis tiling the weight columns / key dim so the fused weights plus
        # the buffered f32 output block still fit v7x's 64 MiB VMEM.
        in_specs = [pl.BlockSpec((bt, S, H), lambda i: (i, 0, 0), **stream_kw)]
        in_specs += [pl.BlockSpec(shape, rep, **const_kw)
                     for shape in weight_shapes]
        in_specs += [pl.BlockSpec((F, H), rep, **const_kw)]
        out_specs = pl.BlockSpec((bt, 2, F + S, S), lambda i: (i, 0, 0, 0),
                                 **stream_kw)
        return pl.pallas_call(
            kernel,
            out_shape=out_shape,
            grid_spec=pltpu.PrefetchScalarGridSpec(
                num_scalar_prefetch=0,
                grid=grid,
                in_specs=in_specs,
                out_specs=out_specs,
                scratch_shapes=[pltpu.VMEM((bt, F + S, H), cdt)],
            ),
            compiler_params=pltpu.CompilerParams(
                dimension_semantics=dim_sem,
                vmem_limit_bytes=vmem_limit_bytes),
            cost_estimate=cost,
        )

    args = (enc_c, *weight_args, femb)
    try:
        return build(True)(*args)
    except Exception as first_err:
        # Some Pallas builds reject pl.Buffered(1) on grid-invariant operands;
        # retry with default double-buffering.  A genuine failure (e.g. VMEM
        # OOM) fails here too, and both errors surface chained (not masked).
        try:
            return build(False)(*args)
        except Exception as second_err:
            raise second_err from first_err


# --------------------------------------------------------------------------- #
# Pure-JAX reference
# --------------------------------------------------------------------------- #
def relation_tagger_ref(enc, params, compute_dtype=jnp.float32):
    """Pure-JAX reference of the PyTorch forward.  With float32 it is the exact
    module semantics; with bfloat16 it mirrors the kernel's cast points
    (bf16 MXU inputs, f32 accumulation, f32 bias adds)."""
    cdt = jnp.dtype(compute_dtype)
    f32 = jnp.float32
    B = enc.shape[0]
    femb = params["field_embeddings"].reshape(-1, params["field_embeddings"].shape[-1])
    enc_c = enc.astype(cdt)
    eh = (jnp.einsum("bsh,oh->bso", enc_c, params["head_w"].astype(cdt),
                     preferred_element_type=f32)
          + params["head_b"].reshape(1, -1).astype(f32)).astype(cdt)
    et = (jnp.einsum("bsh,oh->bso", enc_c, params["tail_w"].astype(cdt),
                     preferred_element_type=f32)
          + params["tail_b"].reshape(1, -1).astype(f32)).astype(cdt)
    t0 = jnp.einsum("bsh,oh->bso", et, params["w_label_0"].astype(cdt),
                    preferred_element_type=f32).astype(cdt)
    t1 = jnp.einsum("bsh,oh->bso", et, params["w_label_1"].astype(cdt),
                    preferred_element_type=f32).astype(cdt)
    cat = jnp.concatenate(
        [jnp.broadcast_to(femb.astype(cdt)[None], (B,) + femb.shape), eh], axis=1)
    s0 = jnp.einsum("bqh,bkh->bqk", cat, t0, preferred_element_type=f32)
    s1 = jnp.einsum("bqh,bkh->bqk", cat, t1, preferred_element_type=f32)
    return jnp.stack([s0, s1], axis=1)


if __name__ == "__main__":
    B, S, H, F = 2, 16, 32, 8   # batch, seq, hidden_size, n_fields
    key = jax.random.PRNGKey(0)
    ks = jax.random.split(key, 8)
    params = {
        "head_w": 0.1 * jax.random.normal(ks[0], (H, H), jnp.float32),
        "head_b": 0.1 * jax.random.normal(ks[1], (1, H), jnp.float32),
        "tail_w": 0.1 * jax.random.normal(ks[2], (H, H), jnp.float32),
        "tail_b": 0.1 * jax.random.normal(ks[3], (1, H), jnp.float32),
        "field_embeddings": jax.random.uniform(ks[4], (1, F, H), jnp.float32),
        "w_label_0": 0.1 * jax.random.normal(ks[5], (H, H), jnp.float32),
        "w_label_1": 0.1 * jax.random.normal(ks[6], (H, H), jnp.float32),
    }
    enc = jax.random.normal(ks[7], (B, S, H), jnp.float32)

    out = jax.block_until_ready(relation_tagger(enc, params))
    assert out.shape == (B, 2, F + S, S), out.shape
    # Tight check against a reference mirroring the kernel's bf16 cast points.
    ref_bf16 = relation_tagger_ref(enc, params, compute_dtype=jnp.bfloat16)
    assert jnp.allclose(out, ref_bf16, rtol=2e-2, atol=2e-2), "mismatch (bf16 ref)"
    # Loose check against the exact f32 module semantics.
    ref_f32 = relation_tagger_ref(enc, params, compute_dtype=jnp.float32)
    assert jnp.allclose(out, ref_f32, rtol=1e-1, atol=1e-1), "mismatch (f32 module)"
    print("KERNEL_OK")
</pallas_src>

<mosaic_0001>
module attributes {stable_mosaic.version = 11 : i64} {
  func.func @_kernel_split(%arg0: i32, %arg1: memref<2x16x32xbf16, #tpu.memory_space<vmem>>, %arg2: memref<32x32xbf16, #tpu.memory_space<vmem>>, %arg3: memref<32x32xbf16, #tpu.memory_space<vmem>>, %arg4: memref<1x32xf32, #tpu.memory_space<vmem>>, %arg5: memref<1x32xf32, #tpu.memory_space<vmem>>, %arg6: memref<32x32xbf16, #tpu.memory_space<vmem>>, %arg7: memref<32x32xbf16, #tpu.memory_space<vmem>>, %arg8: memref<8x32xbf16, #tpu.memory_space<vmem>>, %arg9: memref<2x2x24x16xf32, #tpu.memory_space<vmem>>, %arg10: memref<2x24x32xbf16, #tpu.memory_space<vmem>>) attributes {dimension_semantics = [#tpu.dimension_semantics<arbitrary>], iteration_bounds = array<i64: 1>, scalar_prefetch = 0 : i64, scratch_operands = 1 : i64, tpu.core_type = #tpu.core_type<tc>, window_params = [{transform_indices = @transform_0, window_bounds = array<i64: 2, 16, 32>}, {pipeline_mode = #tpu.pipeline_mode<synchronous>, transform_indices = @transform_1, window_bounds = array<i64: 32, 32>}, {pipeline_mode = #tpu.pipeline_mode<synchronous>, transform_indices = @transform_2, window_bounds = array<i64: 32, 32>}, {pipeline_mode = #tpu.pipeline_mode<synchronous>, transform_indices = @transform_3, window_bounds = array<i64: 1, 32>}, {pipeline_mode = #tpu.pipeline_mode<synchronous>, transform_indices = @transform_4, window_bounds = array<i64: 1, 32>}, {pipeline_mode = #tpu.pipeline_mode<synchronous>, transform_indices = @transform_5, window_bounds = array<i64: 32, 32>}, {pipeline_mode = #tpu.pipeline_mode<synchronous>, transform_indices = @transform_6, window_bounds = array<i64: 32, 32>}, {pipeline_mode = #tpu.pipeline_mode<synchronous>, transform_indices = @transform_7, window_bounds = array<i64: 8, 32>}, {transform_indices = @transform_8, window_bounds = array<i64: 2, 2, 24, 16>}]} {
    %c0 = arith.constant 0 : index
    %c0_0 = arith.constant 0 : index
    %c0_1 = arith.constant 0 : index
    %0 = vector.load %arg1[%c0, %c0_0, %c0_1] : memref<2x16x32xbf16, #tpu.memory_space<vmem>>, vector<2x16x32xbf16>
    %1 = vector.shape_cast %0 : vector<2x16x32xbf16> to vector<32x32xbf16>
    %c0_2 = arith.constant 0 : index
    %c0_3 = arith.constant 0 : index
    %2 = vector.load %arg2[%c0_2, %c0_3] : memref<32x32xbf16, #tpu.memory_space<vmem>>, vector<32x32xbf16>
    %cst = arith.constant dense<0.000000e+00> : vector<32x32xf32>
    %3 = tpu.matmul %1, %2, %cst {dimension_numbers = #tpu.dot_dimension_numbers<[1], [0], [0], [1], [0, 0, 1, 1], [], []>} : vector<32x32xbf16>, vector<32x32xbf16>, vector<32x32xf32> -> vector<32x32xf32>
    %c0_4 = arith.constant 0 : index
    %c0_5 = arith.constant 0 : index
    %4 = vector.load %arg4[%c0_4, %c0_5] : memref<1x32xf32, #tpu.memory_space<vmem>>, vector<1x32xf32>
    %5 = vector.broadcast %4 : vector<1x32xf32> to vector<32x32xf32>
    %6 = arith.addf %3, %5 : vector<32x32xf32>
    %7 = arith.truncf %6 : vector<32x32xf32> to vector<32x32xbf16>
    %8 = vector.shape_cast %7 : vector<32x32xbf16> to vector<2x16x32xbf16>
    %c0_6 = arith.constant 0 : index
    %c0_7 = arith.constant 0 : index
    %9 = vector.load %arg3[%c0_6, %c0_7] : memref<32x32xbf16, #tpu.memory_space<vmem>>, vector<32x32xbf16>
    %cst_8 = arith.constant dense<0.000000e+00> : vector<32x32xf32>
    %10 = tpu.matmul %1, %9, %cst_8 {dimension_numbers = #tpu.dot_dimension_numbers<[1], [0], [0], [1], [0, 0, 1, 1], [], []>} : vector<32x32xbf16>, vector<32x32xbf16>, vector<32x32xf32> -> vector<32x32xf32>
    %c0_9 = arith.constant 0 : index
    %c0_10 = arith.constant 0 : index
    %11 = vector.load %arg5[%c0_9, %c0_10] : memref<1x32xf32, #tpu.memory_space<vmem>>, vector<1x32xf32>
    %12 = vector.broadcast %11 : vector<1x32xf32> to vector<32x32xf32>
    %13 = arith.addf %10, %12 : vector<32x32xf32>
    %14 = arith.truncf %13 : vector<32x32xf32> to vector<32x32xbf16>
    %c0_11 = arith.constant 0 : index
    %c0_12 = arith.constant 0 : index
    %15 = vector.load %arg6[%c0_11, %c0_12] : memref<32x32xbf16, #tpu.memory_space<vmem>>, vector<32x32xbf16>
    %cst_13 = arith.constant dense<0.000000e+00> : vector<32x32xf32>
    %16 = tpu.matmul %14, %15, %cst_13 {dimension_numbers = #tpu.dot_dimension_numbers<[1], [0], [0], [1], [0, 0, 1, 1], [], []>} : vector<32x32xbf16>, vector<32x32xbf16>, vector<32x32xf32> -> vector<32x32xf32>
    %17 = arith.truncf %16 : vector<32x32xf32> to vector<32x32xbf16>
    %18 = vector.shape_cast %17 : vector<32x32xbf16> to vector<2x16x32xbf16>
    %c0_14 = arith.constant 0 : index
    %c0_15 = arith.constant 0 : index
    %19 = vector.load %arg7[%c0_14, %c0_15] : memref<32x32xbf16, #tpu.memory_space<vmem>>, vector<32x32xbf16>
    %cst_16 = arith.constant dense<0.000000e+00> : vector<32x32xf32>
    %20 = tpu.matmul %14, %19, %cst_16 {dimension_numbers = #tpu.dot_dimension_numbers<[1], [0], [0], [1], [0, 0, 1, 1], [], []>} : vector<32x32xbf16>, vector<32x32xbf16>, vector<32x32xf32> -> vector<32x32xf32>
    %21 = arith.truncf %20 : vector<32x32xf32> to vector<32x32xbf16>
    %22 = vector.shape_cast %21 : vector<32x32xbf16> to vector<2x16x32xbf16>
    %c0_i32 = arith.constant 0 : i32
    %23 = arith.cmpi eq, %arg0, %c0_i32 : i32
    %24 = arith.extui %23 : i1 to i32
    %c0_i32_17 = arith.constant 0 : i32
    %25 = arith.cmpi ne, %24, %c0_i32_17 : i32
    scf.if %25 {
      %c0_32 = arith.constant 0 : index
      %c0_33 = arith.constant 0 : index
      %36 = vector.load %arg8[%c0_32, %c0_33] : memref<8x32xbf16, #tpu.memory_space<vmem>>, vector<8x32xbf16>
      %37 = vector.shape_cast %36 : vector<8x32xbf16> to vector<1x8x32xbf16>
      %38 = vector.broadcast %37 : vector<1x8x32xbf16> to vector<2x8x32xbf16>
      %c0_34 = arith.constant 0 : index
      %c0_35 = arith.constant 0 : index
      %c0_36 = arith.constant 0 : index
      %39 = vector.load %arg10[%c0_34, %c0_35, %c0_36] : memref<2x24x32xbf16, #tpu.memory_space<vmem>>, vector<2x8x32xbf16>
      tpu.vector_store %arg10[%c0_34, %c0_35, %c0_36], %38 {strides = array<i32>} : memref<2x24x32xbf16, #tpu.memory_space<vmem>>, vector<2x8x32xbf16>,
    } else {
    }
    %c0_18 = arith.constant 0 : index
    %c8 = arith.constant 8 : index
    %c0_19 = arith.constant 0 : index
    %26 = vector.load %arg10[%c0_18, %c8, %c0_19] : memref<2x24x32xbf16, #tpu.memory_space<vmem>>, vector<2x16x32xbf16>
    tpu.vector_store %arg10[%c0_18, %c8, %c0_19], %8 {strides = array<i32>} : memref<2x24x32xbf16, #tpu.memory_space<vmem>>, vector<2x16x32xbf16>,
    %c0_20 = arith.constant 0 : index
    %c0_21 = arith.constant 0 : index
    %c0_22 = arith.constant 0 : index
    %27 = vector.load %arg10[%c0_20, %c0_21, %c0_22] : memref<2x24x32xbf16, #tpu.memory_space<vmem>>, vector<2x24x32xbf16>
    %cst_23 = arith.constant dense<0.000000e+00> : vector<2x24x16xf32>
    %28 = tpu.matmul %27, %18, %cst_23 {dimension_numbers = #tpu.dot_dimension_numbers<[2], [2], [1], [1], [0, 0, 0, 1, 1, 1], [0], [0]>} : vector<2x24x32xbf16>, vector<2x16x32xbf16>, vector<2x24x16xf32> -> vector<2x24x16xf32>
    %c0_24 = arith.constant 0 : index
    %c0_25 = arith.constant 0 : index
    %c0_26 = arith.constant 0 : index
    %c0_27 = arith.constant 0 : index
    %29 = vector.load %arg9[%c0_24, %c0_25, %c0_26, %c0_27] : memref<2x2x24x16xf32, #tpu.memory_space<vmem>>, vector<2x1x24x16xf32>
    %30 = vector.shape_cast %29 : vector<2x1x24x16xf32> to vector<2x24x16xf32>
    %31 = vector.shape_cast %28 : vector<2x24x16xf32> to vector<2x1x24x16xf32>
    tpu.vector_store %arg9[%c0_24, %c0_25, %c0_26, %c0_27], %31 {strides = array<i32>} : memref<2x2x24x16xf32, #tpu.memory_space<vmem>>, vector<2x1x24x16xf32>,
    %cst_28 = arith.constant dense<0.000000e+00> : vector<2x24x16xf32>
    %32 = tpu.matmul %27, %22, %cst_28 {dimension_numbers = #tpu.dot_dimension_numbers<[2], [2], [1], [1], [0, 0, 0, 1, 1, 1], [0], [0]>} : vector<2x24x32xbf16>, vector<2x16x32xbf16>, vector<2x24x16xf32> -> vector<2x24x16xf32>
    %c0_29 = arith.constant 0 : index
    %c1 = arith.constant 1 : index
    %c0_30 = arith.constant 0 : index
    %c0_31 = arith.constant 0 : index
    %33 = vector.load %arg9[%c0_29, %c1, %c0_30, %c0_31] : memref<2x2x24x16xf32, #tpu.memory_space<vmem>>, vector<2x1x24x16xf32>
    %34 = vector.shape_cast %33 : vector<2x1x24x16xf32> to vector<2x24x16xf32>
    %35 = vector.shape_cast %32 : vector<2x24x16xf32> to vector<2x1x24x16xf32>
    tpu.vector_store %arg9[%c0_29, %c1, %c0_30, %c0_31], %35 {strides = array<i32>} : memref<2x2x24x16xf32, #tpu.memory_space<vmem>>, vector<2x1x24x16xf32>,
    return
  }
  func.func @transform_0(%arg0: i32) -> (i32, i32, i32) {
    %c0_i32 = arith.constant 0 : i32
    %c0_i32_0 = arith.constant 0 : i32
    %c0_i32_1 = arith.constant 0 : i32
    return %arg0, %c0_i32, %c0_i32_0 : i32, i32, i32
  }
  func.func @transform_1(%arg0: i32) -> (i32, i32) {
    %c0_i32 = arith.constant 0 : i32
    %c0_i32_0 = arith.constant 0 : i32
    %c0_i32_1 = arith.constant 0 : i32
    return %c0_i32, %c0_i32_0 : i32, i32
  }
  func.func @transform_2(%arg0: i32) -> (i32, i32) {
    %c0_i32 = arith.constant 0 : i32
    %c0_i32_0 = arith.constant 0 : i32
    %c0_i32_1 = arith.constant 0 : i32
    return %c0_i32, %c0_i32_0 : i32, i32
  }
  func.func @transform_3(%arg0: i32) -> (i32, i32) {
    %c0_i32 = arith.constant 0 : i32
    %c0_i32_0 = arith.constant 0 : i32
    %c0_i32_1 = arith.constant 0 : i32
    return %c0_i32, %c0_i32_0 : i32, i32
  }
  func.func @transform_4(%arg0: i32) -> (i32, i32) {
    %c0_i32 = arith.constant 0 : i32
    %c0_i32_0 = arith.constant 0 : i32
    %c0_i32_1 = arith.constant 0 : i32
    return %c0_i32, %c0_i32_0 : i32, i32
  }
  func.func @transform_5(%arg0: i32) -> (i32, i32) {
    %c0_i32 = arith.constant 0 : i32
    %c0_i32_0 = arith.constant 0 : i32
    %c0_i32_1 = arith.constant 0 : i32
    return %c0_i32, %c0_i32_0 : i32, i32
  }
  func.func @transform_6(%arg0: i32) -> (i32, i32) {
    %c0_i32 = arith.constant 0 : i32
    %c0_i32_0 = arith.constant 0 : i32
    %c0_i32_1 = arith.constant 0 : i32
    return %c0_i32, %c0_i32_0 : i32, i32
  }
  func.func @transform_7(%arg0: i32) -> (i32, i32) {
    %c0_i32 = arith.constant 0 : i32
    %c0_i32_0 = arith.constant 0 : i32
    %c0_i32_1 = arith.constant 0 : i32
    return %c0_i32, %c0_i32_0 : i32, i32
  }
  func.func @transform_8(%arg0: i32) -> (i32, i32, i32, i32) {
    %c0_i32 = arith.constant 0 : i32
    %c0_i32_0 = arith.constant 0 : i32
    %c0_i32_1 = arith.constant 0 : i32
    %c0_i32_2 = arith.constant 0 : i32
    return %arg0, %c0_i32, %c0_i32_0, %c0_i32_1 : i32, i32, i32, i32
  }
}

module attributes {stable_mosaic.version = 11 : i64} {
  func.func @_kernel_split(%arg0: i32, %arg1: memref<2x16x32xbf16, #tpu.memory_space<vmem>>, %arg2: memref<32x32xbf16, #tpu.memory_space<vmem>>, %arg3: memref<32x32xbf16, #tpu.memory_space<vmem>>, %arg4: memref<1x32xf32, #tpu.memory_space<vmem>>, %arg5: memref<1x32xf32, #tpu.memory_space<vmem>>, %arg6: memref<32x32xbf16, #tpu.memory_space<vmem>>, %arg7: memref<32x32xbf16, #tpu.memory_space<vmem>>, %arg8: memref<8x32xbf16, #tpu.memory_space<vmem>>, %arg9: memref<2x2x24x16xf32, #tpu.memory_space<vmem>>, %arg10: memref<2x24x32xbf16, #tpu.memory_space<vmem>>) attributes {dimension_semantics = [#tpu.dimension_semantics<arbitrary>], iteration_bounds = array<i64: 1>, scalar_prefetch = 0 : i64, scratch_operands = 1 : i64, tpu.core_type = #tpu.core_type<tc>, window_params = [{transform_indices = @transform_0, window_bounds = array<i64: 2, 16, 32>}, {pipeline_mode = #tpu.pipeline_mode<synchronous>, transform_indices = @transform_1, window_bounds = array<i64: 32, 32>}, {pipeline_mode = #tpu.pipeline_mode<synchronous>, transform_indices = @transform_2, window_bounds = array<i64: 32, 32>}, {pipeline_mode = #tpu.pipeline_mode<synchronous>, transform_indices = @transform_3, window_bounds = array<i64: 1, 32>}, {pipeline_mode = #tpu.pipeline_mode<synchronous>, transform_indices = @transform_4, window_bounds = array<i64: 1, 32>}, {pipeline_mode = #tpu.pipeline_mode<synchronous>, transform_indices = @transform_5, window_bounds = array<i64: 32, 32>}, {pipeline_mode = #tpu.pipeline_mode<synchronous>, transform_indices = @transform_6, window_bounds = array<i64: 32, 32>}, {pipeline_mode = #tpu.pipeline_mode<synchronous>, transform_indices = @transform_7, window_bounds = array<i64: 8, 32>}, {transform_indices = @transform_8, window_bounds = array<i64: 2, 2, 24, 16>}]} {
    %c0 = arith.constant 0 : index
    %c0_0 = arith.constant 0 : index
    %c0_1 = arith.constant 0 : index
    %0 = vector.load %arg1[%c0, %c0_0, %c0_1] : memref<2x16x32xbf16, #tpu.memory_space<vmem>>, vector<2x16x32xbf16>
    %1 = vector.shape_cast %0 : vector<2x16x32xbf16> to vector<32x32xbf16>
    %c0_2 = arith.constant 0 : index
    %c0_3 = arith.constant 0 : index
    %2 = vector.load %arg2[%c0_2, %c0_3] : memref<32x32xbf16, #tpu.memory_space<vmem>>, vector<32x32xbf16>
    %cst = arith.constant dense<0.000000e+00> : vector<32x32xf32>
    %3 = tpu.matmul %1, %2, %cst {dimension_numbers = #tpu.dot_dimension_numbers<[1], [0], [0], [1], [0, 0, 1, 1], [], []>} : vector<32x32xbf16>, vector<32x32xbf16>, vector<32x32xf32> -> vector<32x32xf32>
    %c0_4 = arith.constant 0 : index
    %c0_5 = arith.constant 0 : index
    %4 = vector.load %arg4[%c0_4, %c0_5] : memref<1x32xf32, #tpu.memory_space<vmem>>, vector<1x32xf32>
    %5 = vector.broadcast %4 : vector<1x32xf32> to vector<32x32xf32>
    %6 = arith.addf %3, %5 : vector<32x32xf32>
    %7 = arith.truncf %6 : vector<32x32xf32> to vector<32x32xbf16>
    %8 = vector.shape_cast %7 : vector<32x32xbf16> to vector<2x16x32xbf16>
    %c0_6 = arith.constant 0 : index
    %c0_7 = arith.constant 0 : index
    %9 = vector.load %arg3[%c0_6, %c0_7] : memref<32x32xbf16, #tpu.memory_space<vmem>>, vector<32x32xbf16>
    %cst_8 = arith.constant dense<0.000000e+00> : vector<32x32xf32>
    %10 = tpu.matmul %1, %9, %cst_8 {dimension_numbers = #tpu.dot_dimension_numbers<[1], [0], [0], [1], [0, 0, 1, 1], [], []>} : vector<32x32xbf16>, vector<32x32xbf16>, vector<32x32xf32> -> vector<32x32xf32>
    %c0_9 = arith.constant 0 : index
    %c0_10 = arith.constant 0 : index
    %11 = vector.load %arg5[%c0_9, %c0_10] : memref<1x32xf32, #tpu.memory_space<vmem>>, vector<1x32xf32>
    %12 = vector.broadcast %11 : vector<1x32xf32> to vector<32x32xf32>
    %13 = arith.addf %10, %12 : vector<32x32xf32>
    %14 = arith.truncf %13 : vector<32x32xf32> to vector<32x32xbf16>
    %c0_11 = arith.constant 0 : index
    %c0_12 = arith.constant 0 : index
    %15 = vector.load %arg6[%c0_11, %c0_12] : memref<32x32xbf16, #tpu.memory_space<vmem>>, vector<32x32xbf16>
    %cst_13 = arith.constant dense<0.000000e+00> : vector<32x32xf32>
    %16 = tpu.matmul %14, %15, %cst_13 {dimension_numbers = #tpu.dot_dimension_numbers<[1], [0], [0], [1], [0, 0, 1, 1], [], []>} : vector<32x32xbf16>, vector<32x32xbf16>, vector<32x32xf32> -> vector<32x32xf32>
    %17 = arith.truncf %16 : vector<32x32xf32> to vector<32x32xbf16>
    %18 = vector.shape_cast %17 : vector<32x32xbf16> to vector<2x16x32xbf16>
    %c0_14 = arith.constant 0 : index
    %c0_15 = arith.constant 0 : index
    %19 = vector.load %arg7[%c0_14, %c0_15] : memref<32x32xbf16, #tpu.memory_space<vmem>>, vector<32x32xbf16>
    %cst_16 = arith.constant dense<0.000000e+00> : vector<32x32xf32>
    %20 = tpu.matmul %14, %19, %cst_16 {dimension_numbers = #tpu.dot_dimension_numbers<[1], [0], [0], [1], [0, 0, 1, 1], [], []>} : vector<32x32xbf16>, vector<32x32xbf16>, vector<32x32xf32> -> vector<32x32xf32>
    %21 = arith.truncf %20 : vector<32x32xf32> to vector<32x32xbf16>
    %22 = vector.shape_cast %21 : vector<32x32xbf16> to vector<2x16x32xbf16>
    %c0_i32 = arith.constant 0 : i32
    %23 = arith.cmpi eq, %arg0, %c0_i32 : i32
    %24 = arith.extui %23 : i1 to i32
    %c0_i32_17 = arith.constant 0 : i32
    %25 = arith.cmpi ne, %24, %c0_i32_17 : i32
    scf.if %25 {
      %c0_32 = arith.constant 0 : index
      %c0_33 = arith.constant 0 : index
      %36 = vector.load %arg8[%c0_32, %c0_33] : memref<8x32xbf16, #tpu.memory_space<vmem>>, vector<8x32xbf16>
      %37 = vector.shape_cast %36 : vector<8x32xbf16> to vector<1x8x32xbf16>
      %38 = vector.broadcast %37 : vector<1x8x32xbf16> to vector<2x8x32xbf16>
      %c0_34 = arith.constant 0 : index
      %c0_35 = arith.constant 0 : index
      %c0_36 = arith.constant 0 : index
      %39 = vector.load %arg10[%c0_34, %c0_35, %c0_36] : memref<2x24x32xbf16, #tpu.memory_space<vmem>>, vector<2x8x32xbf16>
      tpu.vector_store %arg10[%c0_34, %c0_35, %c0_36], %38 {strides = array<i32>} : memref<2x24x32xbf16, #tpu.memory_space<vmem>>, vector<2x8x32xbf16>,
    } else {
    }
    %c0_18 = arith.constant 0 : index
    %c8 = arith.constant 8 : index
    %c0_19 = arith.constant 0 : index
    %26 = vector.load %arg10[%c0_18, %c8, %c0_19] : memref<2x24x32xbf16, #tpu.memory_space<vmem>>, vector<2x16x32xbf16>
    tpu.vector_store %arg10[%c0_18, %c8, %c0_19], %8 {strides = array<i32>} : memref<2x24x32xbf16, #tpu.memory_space<vmem>>, vector<2x16x32xbf16>,
    %c0_20 = arith.constant 0 : index
    %c0_21 = arith.constant 0 : index
    %c0_22 = arith.constant 0 : index
    %27 = vector.load %arg10[%c0_20, %c0_21, %c0_22] : memref<2x24x32xbf16, #tpu.memory_space<vmem>>, vector<2x24x32xbf16>
    %cst_23 = arith.constant dense<0.000000e+00> : vector<2x24x16xf32>
    %28 = tpu.matmul %27, %18, %cst_23 {dimension_numbers = #tpu.dot_dimension_numbers<[2], [2], [1], [1], [0, 0, 0, 1, 1, 1], [0], [0]>} : vector<2x24x32xbf16>, vector<2x16x32xbf16>, vector<2x24x16xf32> -> vector<2x24x16xf32>
    %c0_24 = arith.constant 0 : index
    %c0_25 = arith.constant 0 : index
    %c0_26 = arith.constant 0 : index
    %c0_27 = arith.constant 0 : index
    %29 = vector.load %arg9[%c0_24, %c0_25, %c0_26, %c0_27] : memref<2x2x24x16xf32, #tpu.memory_space<vmem>>, vector<2x1x24x16xf32>
    %30 = vector.shape_cast %29 : vector<2x1x24x16xf32> to vector<2x24x16xf32>
    %31 = vector.shape_cast %28 : vector<2x24x16xf32> to vector<2x1x24x16xf32>
    tpu.vector_store %arg9[%c0_24, %c0_25, %c0_26, %c0_27], %31 {strides = array<i32>} : memref<2x2x24x16xf32, #tpu.memory_space<vmem>>, vector<2x1x24x16xf32>,
    %cst_28 = arith.constant dense<0.000000e+00> : vector<2x24x16xf32>
    %32 = tpu.matmul %27, %22, %cst_28 {dimension_numbers = #tpu.dot_dimension_numbers<[2], [2], [1], [1], [0, 0, 0, 1, 1, 1], [0], [0]>} : vector<2x24x32xbf16>, vector<2x16x32xbf16>, vector<2x24x16xf32> -> vector<2x24x16xf32>
    %c0_29 = arith.constant 0 : index
    %c1 = arith.constant 1 : index
    %c0_30 = arith.constant 0 : index
    %c0_31 = arith.constant 0 : index
    %33 = vector.load %arg9[%c0_29, %c1, %c0_30, %c0_31] : memref<2x2x24x16xf32, #tpu.memory_space<vmem>>, vector<2x1x24x16xf32>
    %34 = vector.shape_cast %33 : vector<2x1x24x16xf32> to vector<2x24x16xf32>
    %35 = vector.shape_cast %32 : vector<2x24x16xf32> to vector<2x1x24x16xf32>
    tpu.vector_store %arg9[%c0_29, %c1, %c0_30, %c0_31], %35 {strides = array<i32>} : memref<2x2x24x16xf32, #tpu.memory_space<vmem>>, vector<2x1x24x16xf32>,
    return
  }
  func.func @transform_0(%arg0: i32) -> (i32, i32, i32) {
    %c0_i32 = arith.constant 0 : i32
    %c0_i32_0 = arith.constant 0 : i32
    %c0_i32_1 = arith.constant 0 : i32
    return %arg0, %c0_i32, %c0_i32_0 : i32, i32, i32
  }
  func.func @transform_1(%arg0: i32) -> (i32, i32) {
    %c0_i32 = arith.constant 0 : i32
    %c0_i32_0 = arith.constant 0 : i32
    %c0_i32_1 = arith.constant 0 : i32
    return %c0_i32, %c0_i32_0 : i32, i32
  }
  func.func @transform_2(%arg0: i32) -> (i32, i32) {
    %c0_i32 = arith.constant 0 : i32
    %c0_i32_0 = arith.constant 0 : i32
    %c0_i32_1 = arith.constant 0 : i32
    return %c0_i32, %c0_i32_0 : i32, i32
  }
  func.func @transform_3(%arg0: i32) -> (i32, i32) {
    %c0_i32 = arith.constant 0 : i32
    %c0_i32_0 = arith.constant 0 : i32
    %c0_i32_1 = arith.constant 0 : i32
    return %c0_i32, %c0_i32_0 : i32, i32
  }
  func.func @transform_4(%arg0: i32) -> (i32, i32) {
    %c0_i32 = arith.constant 0 : i32
    %c0_i32_0 = arith.constant 0 : i32
    %c0_i32_1 = arith.constant 0 : i32
    return %c0_i32, %c0_i32_0 : i32, i32
  }
  func.func @transform_5(%arg0: i32) -> (i32, i32) {
    %c0_i32 = arith.constant 0 : i32
    %c0_i32_0 = arith.constant 0 : i32
    %c0_i32_1 = arith.constant 0 : i32
    return %c0_i32, %c0_i32_0 : i32, i32
  }
  func.func @transform_6(%arg0: i32) -> (i32, i32) {
    %c0_i32 = arith.constant 0 : i32
    %c0_i32_0 = arith.constant 0 : i32
    %c0_i32_1 = arith.constant 0 : i32
    return %c0_i32, %c0_i32_0 : i32, i32
  }
  func.func @transform_7(%arg0: i32) -> (i32, i32) {
    %c0_i32 = arith.constant 0 : i32
    %c0_i32_0 = arith.constant 0 : i32
    %c0_i32_1 = arith.constant 0 : i32
    return %c0_i32, %c0_i32_0 : i32, i32
  }
  func.func @transform_8(%arg0: i32) -> (i32, i32, i32, i32) {
    %c0_i32 = arith.constant 0 : i32
    %c0_i32_0 = arith.constant 0 : i32
    %c0_i32_1 = arith.constant 0 : i32
    %c0_i32_2 = arith.constant 0 : i32
    return %arg0, %c0_i32, %c0_i32_0, %c0_i32_1 : i32, i32, i32, i32
  }
}

</mosaic_0001>

<bundles_post_ra>
// kernel: tpu_custom_call.1
= control target key start
LH: loop header
LB: loop body
LE: loop exit
PB: predicated region body
PF: predicated region fallthrough
CT: control target
= control target key end

     0   :  { %13 = vsyncpa [#allocation4], 0  ;;  %s830_s0 = inlined_call_operand.hbm [shape: bf16[2,16,32], index: 0, kind: input, shape index: {}]   ;;  %s831_s1 = inlined_call_operand.hbm [shape: bf16[32,32], index: 1, kind: input, shape index: {}]   ;;  %s832_s2 = inlined_call_operand.hbm [shape: bf16[32,32], index: 2, kind: input, shape index: {}]   ;;  %s833_s3 = inlined_call_operand.vmem [shape: f32[1,32], index: 3, kind: input, shape index: {}]   ;;  %s834_s4 = inlined_call_operand.vmem [shape: f32[1,32], index: 4, kind: input, shape index: {}]   ;;  %s835_s5 = inlined_call_operand.hbm [shape: bf16[32,32], index: 5, kind: input, shape index: {}]   ;;  %s836_s6 = inlined_call_operand.hbm [shape: bf16[32,32], index: 6, kind: input, shape index: {}]   ;;  %s837_s7 = inlined_call_operand.vmem [shape: bf16[8,32], index: 7, kind: input, shape index: {}]   ;;  %s838_s8 = inlined_call_operand.vmem [shape: f32[2,2,24,16], index: 8, kind: output, shape index: {}]  }
   0x1   :  { %14 = vsyncpa [#allocation6], 0 }
   0x2   :  { %15 = vsyncpa [#allocation9], 0  ;;  %s33_s29 = sshll.u32 %s831_s1, 4  ;;  %s686_s30 = smov [#allocation5]   ;;  %s34_s29 = int_to_ptr.hbm [resolvable:$true] %s33_s29 }
   0x3   :  { %s35_s9 = sshll.u32 %s686_s30, 4  ;;  %s63_s12 = sshll.u32 %s835_s5, 4  ;;  %s36_s9 = int_to_ptr.vmem [resolvable:$true] %s35_s9  ;;  %s64_s12 = int_to_ptr.hbm [resolvable:$true] %s63_s12 }
   0x4   :  { %s687_s13 = smov 64   ;;  %s688_s14 = smov 4  }
   0x5   :  { %41 = dma.hbm_to_vmem [thread:$0]  %s34_s29, 256, %s36_s9, [#allocation6], %s687_s13, %s687_s13, %s688_s14  }
   0x6   :  { %s689_s15 = smov [#allocation8]   ;;  %s20_s19 = sshll.u32 %s830_s0, 4  ;;  %s21_s19 = int_to_ptr.hbm [resolvable:$true] %s20_s19 }
   0x7   :  { %s65_s16 = sshll.u32 %s689_s15, 4  ;;  %s46_s21 = sshll.u32 %s832_s2, 4  ;;  %s66_s16 = int_to_ptr.vmem [resolvable:$true] %s65_s16  ;;  %s47_s21 = int_to_ptr.hbm [resolvable:$true] %s46_s21 }
   0x8   :  { %71 = dma.hbm_to_vmem [thread:$0]  %s64_s12, 256, %s66_s16, [#allocation9], %s687_s13, %s687_s13, %s688_s14  }
   0x9   :  { %s690_s22 = smov [#allocation3]   ;;  %s691_s5 = smov [#allocation7]  }
   0xa   :  { %s22_s23 = sshll.u32 %s690_s22, 4  ;;  %s48_s24 = sshll.u32 %s691_s5, 4  ;;  %s23_s23 = int_to_ptr.vmem [resolvable:$true] %s22_s23  ;;  %s49_s24 = int_to_ptr.vmem [resolvable:$true] %s48_s24 }
   0xb   :  { %28 = dma.hbm_to_vmem [thread:$0]  %s21_s19, 256, %s23_s23, [#allocation4], %s687_s13, %s687_s13, %s688_s14  }
   0xc   :  { %s76_s27 = sshll.u32 %s836_s6, 4  ;;  %s692_s0 = smov [#allocation10]   ;;  %s77_s27 = int_to_ptr.hbm [resolvable:$true] %s76_s27 }
   0xd   :  { %54 = dma.hbm_to_vmem [thread:$0]  %s47_s21, 256, %s49_s24, [#allocation6], %s687_s13, %s687_s13, %s688_s14  }
   0xe   :  { %s78_s28 = sshll.u32 %s692_s0, 4  ;;  %s79_s28 = int_to_ptr.vmem [resolvable:$true] %s78_s28 }
   0xf   :  { %84 = dma.hbm_to_vmem [thread:$0]  %s77_s27, 256, %s79_s28, [#allocation9], %s687_s13, %s687_s13, %s688_s14  }
  0x10   :  { %680 = dma.done.wait [#allocation4], 256  }
  0x11   :  { %681 = vsyncadd [#allocation4], 4294967040 }
  0x12   :  { %682 = dma.done.wait [#allocation6], 512  }
  0x13   :  { %683 = vsyncadd [#allocation6], 4294966784 }
  0x14   :  { %684 = dma.done.wait [#allocation9], 512  }
  0x15   :  { %685 = vsyncadd [#allocation9], 4294966784  ;;  %v544_v0 = vld [vmem:[#allocation7 + $0x8] sm:$0xff]  ;;  %v543_v1 = vld [vmem:[#allocation7] sm:$0xff]  ;;  %vm142_vm0 = vcmask 261120   ;;  %vm302_vm1 = vcmask 257024  }
  0x16   :  { %198 = vmatpush.bf16.msra.mxu1 %v544_v0  ;;  %v539_v2 = vld [vmem:[#allocation3] sm:$0xff]  ;;  %v540_v3 = vld [vmem:[#allocation3 + $0x8] sm:$0xff]  ;;  %v546_v4 = vld [vmem:[#allocation8 + $0x8] sm:$0xff]  ;;  %vm396_vm2 = vcmask 130048  }
  0x17   :  { %v548_v5 = vld [vmem:[#allocation10 + $0x8] sm:$0xff]  ;;  %241 = vmatpush.bf16.msra.mxu2 %v546_v4  ;;  %v545_v6 = vld [vmem:[#allocation8] sm:$0xff]  ;;  %v547_v7 = vld [vmem:[#allocation10] sm:$0xff] }
  0x18   :  { %280 = vmatpush.bf16.msra.mxu3 %v548_v5  ;;  %v542_v8 = vld [vmem:[#allocation5 + $0x8] sm:$0xff]  ;;  %v541_v9 = vld [vmem:[#allocation5] sm:$0xff]  ;;  %v558_v11 = vld [vmem:[%s834_s4] ss:$0 sm:$0xff] }
  0x19   :  { %155 = vmatpush.bf16.msra.mxu0 %v542_v8  ;;  %v559_v22 = vld [vmem:[%s833_s3] ss:$0 sm:$0xff] }
  0x1a   :  { %199 = vmatpush.bf16.msra.mxu1 %v543_v1  ;;  %v301_v26 = vld [vmem:[%s837_s7] sm:$0xf] }
  0x1b   :  { %242 = vmatpush.bf16.msra.mxu2 %v545_v6  ;;  %303 = vst.msk [vmem:[#allocation2] sm:$0xf] %vm302_vm1, %v301_v26 }
  0x1c   :  { %281 = vmatpush.bf16.msra.mxu3 %v547_v7  ;;  %304 = vst.msk [vmem:[#allocation2 + $0xc] sm:$0xf] %vm302_vm1, %v301_v26 }
  0x1d   :  { %495 = vmatmul.msk.bf16.vlgmr.msra.gmra.mxu1 %vm142_vm0, %v539_v2  ;;  %156 = vmatpush.bf16.msra.mxu0 %v541_v9 }
  0x20   :  { %485 = vmatmul.msk.bf16.vlgmr.msra.gmra.mxu0 %vm142_vm0, %v539_v2 }
  0x2d   :  { %496 = vmatmul.msk.bf16.gmra.mxu1 %vm142_vm0, %v540_v3 }
  0x30   :  { %486 = vmatmul.msk.bf16.gmra.mxu0 %vm142_vm0, %v540_v3 }
  0x9a   :  { %v201_v10 = vpop.f32.mrf.mxu1 }
  0x9b   :  { %v202_v13 = vadd.f32 %v558_v11, %v201_v10 }
  0x9d   :  { %v158_v21 = vpop.f32.mrf.mxu0 }
  0x9e   :  { %v159_v24 = vadd.f32 %v559_v22, %v158_v21 }
  0xa0   :  { %v168_v27 = vpack.c.bf16 %v159_v24, %v159_v24 }
  0xa2   :  { %v203_v12 = vpop.f32.mrf.mxu1  ;;  %306 = vst.msk [vmem:[#allocation2 + $0x4] sm:$0xf] %vm302_vm1, %v168_v27 }
  0xa3   :  { %v204_v14 = vadd.f32 %v558_v11, %v203_v12 }
  0xa5   :  { %v211_v15 = vpack.c.bf16 %v204_v14, %v202_v13  ;;  %v160_v23 = vpop.f32.mrf.mxu0 }
  0xa6   :  { %v161_v25 = vadd.f32 %v559_v22, %v160_v23 }
  0xa7   :  { %505 = vmatmul.msk.bf16.vlgmr.msra.gmra.mxu2 %vm142_vm0, %v211_v15  ;;  %515 = vmatmul.msk.bf16.vlgmr.msra.gmra.mxu3 %vm142_vm0, %v211_v15 }
  0xa8   :  { %v169_v28 = vpack.c.bf16 %v161_v25, %v161_v25 }
  0xa9   :  { %v549_v53 = vld [vmem:[#allocation2] sm:$0xff] }
  0xaa   :  { %v206_v16 = vpop.f32.mrf.mxu1  ;;  %307 = vst.msk [vmem:[#allocation2 + $0x8] sm:$0xf] %vm302_vm1, %v169_v28 }
  0xab   :  { %v207_v18 = vadd.f32 %v558_v11, %v206_v16 }
  0xad   :  { %v163_v29 = vpop.f32.mrf.mxu0 }
  0xae   :  { %v164_v31 = vadd.f32 %v559_v22, %v163_v29 }
  0xb0   :  { %v170_v33 = vpack.c.bf16 %v164_v31, %v164_v31 }
  0xb1   :  { %v312_v2 = vld [vmem:[#allocation2 + $0x8] sm:$0xf] }
  0xb2   :  { %v208_v17 = vpop.f32.mrf.mxu1  ;;  %308 = vst.msk [vmem:[#allocation2 + $0x10] sm:$0xf] %vm302_vm1, %v170_v33  ;;  %v321_v5 = vunpack.c.l.b16 %v312_v2 }
  0xb3   :  { %v209_v19 = vadd.f32 %v558_v11, %v208_v17 }
  0xb4   :  { %v323_v7 = vpack.c.b16 %v321_v5, %v321_v5 }
  0xb5   :  { %v212_v20 = vpack.c.bf16 %v209_v19, %v207_v18  ;;  %v165_v30 = vpop.f32.mrf.mxu0 }
  0xb6   :  { %v166_v32 = vadd.f32 %v559_v22, %v165_v30 }
  0xb7   :  { %506 = vmatmul.msk.bf16.gmra.mxu2 %vm142_vm0, %v212_v20  ;;  %516 = vmatmul.msk.bf16.gmra.mxu3 %vm142_vm0, %v212_v20 }
  0xb8   :  { %v171_v34 = vpack.c.bf16 %v166_v32, %v166_v32 }
  0xb9   :  { %v550_v6 = vld [vmem:[#allocation2 + $0xc] sm:$0xff] }
  0xba   :  { %309 = vst.msk [vmem:[#allocation2 + $0x14] sm:$0xf] %vm302_vm1, %v171_v34 }
  0xc1   :  { %v315_v8 = vld [vmem:[#allocation2 + $0x14] sm:$0xf] }
  0xc2   :  { %v361_v9 = vunpack.c.l.b16 %v315_v8 }
  0xc4   :  { %v363_v10 = vpack.c.b16 %v361_v9, %v361_v9 }
 0x12a   :  { %v244_v35 = vpop.f32.mrf.mxu2  ;;  %v283_v36 = vpop.f32.mrf.mxu3 }
 0x12b   :  { %v254_v37 = vpack.c.bf16 %v244_v35, %v244_v35  ;;  %v293_v38 = vpack.c.bf16 %v283_v36, %v283_v36 }
 0x12d   :  { %v326_v43 = vunpack.c.l.b16 %v254_v37  ;;  %v405_v44 = vunpack.c.l.b16 %v293_v38 }
 0x132   :  { %v246_v39 = vpop.f32.mrf.mxu2  ;;  %v285_v40 = vpop.f32.mrf.mxu3 }
 0x133   :  { %v255_v41 = vpack.c.bf16 %v246_v39, %v246_v39  ;;  %v294_v42 = vpack.c.bf16 %v285_v40, %v285_v40 }
 0x135   :  { %v327_v45 = vunpack.c.l.b16 %v255_v41  ;;  %v406_v46 = vunpack.c.l.b16 %v294_v42 }
 0x137   :  { %v328_v47 = vpack.c.b16 %v327_v45, %v326_v43  ;;  %v407_v48 = vpack.c.b16 %v406_v46, %v405_v44 }
 0x139   :  { %v336_v49 = vsel %vm142_vm0, %v328_v47, 0  ;;  %v409_v50 = vsel %vm142_vm0, %v407_v48, 0 }
 0x13a   :  { %v249_v51 = vpop.f32.mrf.mxu2  ;;  %v288_v52 = vpop.f32.mrf.mxu3  ;;  %345 = vmatpush.bf16.xpose.msrb.mxu0 %v336_v49  ;;  %418 = vmatpush.bf16.xpose.msrb.mxu2 %v409_v50 }
 0x13b   :  { %v256_v54 = vpack.c.bf16 %v249_v51, %v249_v51  ;;  %v295_v55 = vpack.c.bf16 %v288_v52, %v288_v52 }
 0x13d   :  { %v366_v60 = vunpack.c.l.b16 %v256_v54  ;;  %v431_v61 = vunpack.c.l.b16 %v295_v55 }
 0x141   :  { %521 = vmatmul.msk.bf16.vlgmr.msrb.gmra.mxu0 %vm142_vm0, %v549_v53  ;;  %529 = vmatmul.msk.bf16.vlgmr.msrb.gmra.mxu2 %vm142_vm0, %v549_v53 }
 0x142   :  { %v251_v56 = vpop.f32.mrf.mxu2  ;;  %v290_v57 = vpop.f32.mrf.mxu3 }
 0x143   :  { %v257_v58 = vpack.c.bf16 %v251_v56, %v251_v56  ;;  %v296_v59 = vpack.c.bf16 %v290_v57, %v290_v57 }
 0x145   :  { %v367_v62 = vunpack.c.l.b16 %v257_v58  ;;  %v432_v63 = vunpack.c.l.b16 %v296_v59 }
 0x147   :  { %v368_v0 = vpack.c.b16 %v367_v62, %v366_v60  ;;  %v433_v1 = vpack.c.b16 %v432_v63, %v431_v61 }
 0x149   :  { %v376_v3 = vsel %vm142_vm0, %v368_v0, 0  ;;  %v435_v4 = vsel %vm142_vm0, %v433_v1, 0 }
 0x14a   :  { %385 = vmatpush.bf16.xpose.msrb.mxu1 %v376_v3  ;;  %444 = vmatpush.bf16.xpose.msrb.mxu3 %v435_v4 }
 0x151   :  { %522 = vmatmul.msk.bf16.gmra.mxu0 %vm142_vm0, %v323_v7  ;;  %527 = vmatmul.msk.bf16.vlgmr.msrb.gmra.mxu1 %vm142_vm0, %v550_v6 }
 0x152   :  { %530 = vmatmul.msk.bf16.gmra.mxu2 %vm142_vm0, %v323_v7  ;;  %531 = vmatmul.msk.bf16.vlgmr.msrb.gmra.mxu3 %vm142_vm0, %v550_v6 }
 0x161   :  { %528 = vmatmul.msk.bf16.gmra.mxu1 %vm142_vm0, %v363_v10 }
 0x162   :  { %532 = vmatmul.msk.bf16.gmra.mxu3 %vm142_vm0, %v363_v10 }
 0x1be   :  { %v347_v11 = vpop.f32.mrf.mxu0 }
 0x1bf   :  { %397 = vst.msk [vmem:[%s838_s8] sm:$0xff] %vm396_vm2, %v347_v11 }
 0x1c4   :  { %v420_v12 = vpop.f32.mrf.mxu2 }
 0x1c5   :  { %533 = vst.msk [vmem:[%s838_s8 + $0x18] sm:$0xff] %vm396_vm2, %v420_v12 }
 0x1c6   :  { %v349_v13 = vpop.f32.mrf.mxu0 }
 0x1c7   :  { %398 = vst.msk [vmem:[%s838_s8 + $0x8] sm:$0xff] %vm396_vm2, %v349_v13 }
 0x1cc   :  { %v422_v14 = vpop.f32.mrf.mxu2 }
 0x1cd   :  { %534 = vst.msk [vmem:[%s838_s8 + $0x20] sm:$0xff] %vm396_vm2, %v422_v14 }
 0x1ce   :  { %v352_v15 = vpop.f32.mrf.mxu0  ;;  %v387_v16 = vpop.f32.mrf.mxu1 }
 0x1cf   :  { %399 = vst.msk [vmem:[%s838_s8 + $0x10] sm:$0xff] %vm396_vm2, %v352_v15 }
 0x1d0   :  { %400 = vst.msk [vmem:[%s838_s8 + $0x30] sm:$0xff] %vm396_vm2, %v387_v16 }
 0x1d5   :  { %v425_v17 = vpop.f32.mrf.mxu2  ;;  %v446_v18 = vpop.f32.mrf.mxu3 }
 0x1d6   :  { %535 = vst.msk [vmem:[%s838_s8 + $0x28] sm:$0xff] %vm396_vm2, %v425_v17  ;;  %v354_v19 = vpop.f32.mrf.mxu0  ;;  %v389_v20 = vpop.f32.mrf.mxu1 }
 0x1d7   :  { %536 = vst.msk [vmem:[%s838_s8 + $0x48] sm:$0xff] %vm396_vm2, %v446_v18 }
 0x1d8   :  { %401 = vst.msk [vmem:[%s838_s8 + $0x38] sm:$0xff] %vm396_vm2, %v389_v20 }
 0x1dd   :  { %v427_v21 = vpop.f32.mrf.mxu2  ;;  %v448_v22 = vpop.f32.mrf.mxu3 }
 0x1de   :  { %537 = vst.msk [vmem:[%s838_s8 + $0x50] sm:$0xff] %vm396_vm2, %v448_v22  ;;  %v392_v23 = vpop.f32.mrf.mxu1 }
 0x1df   :  { %402 = vst.msk [vmem:[%s838_s8 + $0x40] sm:$0xff] %vm396_vm2, %v392_v23 }
 0x1e5   :  { %v451_v24 = vpop.f32.mrf.mxu3 }
 0x1e6   :  { %538 = vst.msk [vmem:[%s838_s8 + $0x58] sm:$0xff] %vm396_vm2, %v451_v24  ;;  %v394_v25 = vpop.f32.mrf.mxu1 }
 0x1ed   :  { %v453_v26 = vpop.f32.mrf.mxu3 }
 0x1ee   :  { %466 = vsyncpa [#allocation4], 1 }
 0x1ef   :  { %467 = vsyncpa [#allocation6], 1 }
 0x1f0   :  { %468 = vsyncpa [#allocation9], 1 }

// kernel: tpu_custom_call.1
= control target key start
LH: loop header
LB: loop body
LE: loop exit
PB: predicated region body
PF: predicated region fallthrough
CT: control target
= control target key end

     0   :  { %13 = vsyncpa [#allocation4], 0  ;;  %s830_s0 = inlined_call_operand.hbm [shape: bf16[2,16,32], index: 0, kind: input, shape index: {}]   ;;  %s831_s1 = inlined_call_operand.hbm [shape: bf16[32,32], index: 1, kind: input, shape index: {}]   ;;  %s832_s2 = inlined_call_operand.hbm [shape: bf16[32,32], index: 2, kind: input, shape index: {}]   ;;  %s833_s3 = inlined_call_operand.vmem [shape: f32[1,32], index: 3, kind: input, shape index: {}]   ;;  %s834_s4 = inlined_call_operand.vmem [shape: f32[1,32], index: 4, kind: input, shape index: {}]   ;;  %s835_s5 = inlined_call_operand.hbm [shape: bf16[32,32], index: 5, kind: input, shape index: {}]   ;;  %s836_s6 = inlined_call_operand.hbm [shape: bf16[32,32], index: 6, kind: input, shape index: {}]   ;;  %s837_s7 = inlined_call_operand.vmem [shape: bf16[8,32], index: 7, kind: input, shape index: {}]   ;;  %s838_s8 = inlined_call_operand.vmem [shape: f32[2,2,24,16], index: 8, kind: output, shape index: {}]  }
   0x1   :  { %14 = vsyncpa [#allocation6], 0 }
   0x2   :  { %15 = vsyncpa [#allocation9], 0  ;;  %s33_s29 = sshll.u32 %s831_s1, 4  ;;  %s686_s30 = smov [#allocation5]   ;;  %s34_s29 = int_to_ptr.hbm [resolvable:$true] %s33_s29 }
   0x3   :  { %s35_s9 = sshll.u32 %s686_s30, 4  ;;  %s63_s12 = sshll.u32 %s835_s5, 4  ;;  %s36_s9 = int_to_ptr.vmem [resolvable:$true] %s35_s9  ;;  %s64_s12 = int_to_ptr.hbm [resolvable:$true] %s63_s12 }
   0x4   :  { %s687_s13 = smov 64   ;;  %s688_s14 = smov 4  }
   0x5   :  { %41 = dma.hbm_to_vmem [thread:$0]  %s34_s29, 256, %s36_s9, [#allocation6], %s687_s13, %s687_s13, %s688_s14  }
   0x6   :  { %s689_s15 = smov [#allocation8]   ;;  %s20_s19 = sshll.u32 %s830_s0, 4  ;;  %s21_s19 = int_to_ptr.hbm [resolvable:$true] %s20_s19 }
   0x7   :  { %s65_s16 = sshll.u32 %s689_s15, 4  ;;  %s46_s21 = sshll.u32 %s832_s2, 4  ;;  %s66_s16 = int_to_ptr.vmem [resolvable:$true] %s65_s16  ;;  %s47_s21 = int_to_ptr.hbm [resolvable:$true] %s46_s21 }
   0x8   :  { %71 = dma.hbm_to_vmem [thread:$0]  %s64_s12, 256, %s66_s16, [#allocation9], %s687_s13, %s687_s13, %s688_s14  }
   0x9   :  { %s690_s22 = smov [#allocation3]   ;;  %s691_s5 = smov [#allocation7]  }
   0xa   :  { %s22_s23 = sshll.u32 %s690_s22, 4  ;;  %s48_s24 = sshll.u32 %s691_s5, 4  ;;  %s23_s23 = int_to_ptr.vmem [resolvable:$true] %s22_s23  ;;  %s49_s24 = int_to_ptr.vmem [resolvable:$true] %s48_s24 }
   0xb   :  { %28 = dma.hbm_to_vmem [thread:$0]  %s21_s19, 256, %s23_s23, [#allocation4], %s687_s13, %s687_s13, %s688_s14  }
   0xc   :  { %s76_s27 = sshll.u32 %s836_s6, 4  ;;  %s692_s0 = smov [#allocation10]   ;;  %s77_s27 = int_to_ptr.hbm [resolvable:$true] %s76_s27 }
   0xd   :  { %54 = dma.hbm_to_vmem [thread:$0]  %s47_s21, 256, %s49_s24, [#allocation6], %s687_s13, %s687_s13, %s688_s14  }
   0xe   :  { %s78_s28 = sshll.u32 %s692_s0, 4  ;;  %s79_s28 = int_to_ptr.vmem [resolvable:$true] %s78_s28 }
   0xf   :  { %84 = dma.hbm_to_vmem [thread:$0]  %s77_s27, 256, %s79_s28, [#allocation9], %s687_s13, %s687_s13, %s688_s14  }
  0x10   :  { %680 = dma.done.wait [#allocation4], 256  }
  0x11   :  { %681 = vsyncadd [#allocation4], 4294967040 }
  0x12   :  { %682 = dma.done.wait [#allocation6], 512  }
  0x13   :  { %683 = vsyncadd [#allocation6], 4294966784 }
  0x14   :  { %684 = dma.done.wait [#allocation9], 512  }
  0x15   :  { %685 = vsyncadd [#allocation9], 4294966784  ;;  %v544_v0 = vld [vmem:[#allocation7 + $0x8] sm:$0xff]  ;;  %v543_v1 = vld [vmem:[#allocation7] sm:$0xff]  ;;  %vm142_vm0 = vcmask 261120   ;;  %vm302_vm1 = vcmask 257024  }
  0x16   :  { %198 = vmatpush.bf16.msra.mxu1 %v544_v0  ;;  %v539_v2 = vld [vmem:[#allocation3] sm:$0xff]  ;;  %v540_v3 = vld [vmem:[#allocation3 + $0x8] sm:$0xff]  ;;  %v546_v4 = vld [vmem:[#allocation8 + $0x8] sm:$0xff]  ;;  %vm396_vm2 = vcmask 130048  }
  0x17   :  { %v548_v5 = vld [vmem:[#allocation10 + $0x8] sm:$0xff]  ;;  %241 = vmatpush.bf16.msra.mxu2 %v546_v4  ;;  %v545_v6 = vld [vmem:[#allocation8] sm:$0xff]  ;;  %v547_v7 = vld [vmem:[#allocation10] sm:$0xff] }
  0x18   :  { %280 = vmatpush.bf16.msra.mxu3 %v548_v5  ;;  %v542_v8 = vld [vmem:[#allocation5 + $0x8] sm:$0xff]  ;;  %v541_v9 = vld [vmem:[#allocation5] sm:$0xff]  ;;  %v558_v11 = vld [vmem:[%s834_s4] ss:$0 sm:$0xff] }
  0x19   :  { %155 = vmatpush.bf16.msra.mxu0 %v542_v8  ;;  %v559_v22 = vld [vmem:[%s833_s3] ss:$0 sm:$0xff] }
  0x1a   :  { %199 = vmatpush.bf16.msra.mxu1 %v543_v1  ;;  %v301_v26 = vld [vmem:[%s837_s7] sm:$0xf] }
  0x1b   :  { %242 = vmatpush.bf16.msra.mxu2 %v545_v6  ;;  %303 = vst.msk [vmem:[#allocation2] sm:$0xf] %vm302_vm1, %v301_v26 }
  0x1c   :  { %281 = vmatpush.bf16.msra.mxu3 %v547_v7  ;;  %304 = vst.msk [vmem:[#allocation2 + $0xc] sm:$0xf] %vm302_vm1, %v301_v26 }
  0x1d   :  { %495 = vmatmul.msk.bf16.vlgmr.msra.gmra.mxu1 %vm142_vm0, %v539_v2  ;;  %156 = vmatpush.bf16.msra.mxu0 %v541_v9 }
  0x20   :  { %485 = vmatmul.msk.bf16.vlgmr.msra.gmra.mxu0 %vm142_vm0, %v539_v2 }
  0x2d   :  { %496 = vmatmul.msk.bf16.gmra.mxu1 %vm142_vm0, %v540_v3 }
  0x30   :  { %486 = vmatmul.msk.bf16.gmra.mxu0 %vm142_vm0, %v540_v3 }
  0x9a   :  { %v201_v10 = vpop.f32.mrf.mxu1 }
  0x9b   :  { %v202_v13 = vadd.f32 %v558_v11, %v201_v10 }
  0x9d   :  { %v158_v21 = vpop.f32.mrf.mxu0 }
  0x9e   :  { %v159_v24 = vadd.f32 %v559_v22, %v158_v21 }
  0xa0   :  { %v168_v27 = vpack.c.bf16 %v159_v24, %v159_v24 }
  0xa2   :  { %v203_v12 = vpop.f32.mrf.mxu1  ;;  %306 = vst.msk [vmem:[#allocation2 + $0x4] sm:$0xf] %vm302_vm1, %v168_v27 }
  0xa3   :  { %v204_v14 = vadd.f32 %v558_v11, %v203_v12 }
  0xa5   :  { %v211_v15 = vpack.c.bf16 %v204_v14, %v202_v13  ;;  %v160_v23 = vpop.f32.mrf.mxu0 }
  0xa6   :  { %v161_v25 = vadd.f32 %v559_v22, %v160_v23 }
  0xa7   :  { %505 = vmatmul.msk.bf16.vlgmr.msra.gmra.mxu2 %vm142_vm0, %v211_v15  ;;  %515 = vmatmul.msk.bf16.vlgmr.msra.gmra.mxu3 %vm142_vm0, %v211_v15 }
  0xa8   :  { %v169_v28 = vpack.c.bf16 %v161_v25, %v161_v25 }
  0xa9   :  { %v549_v53 = vld [vmem:[#allocation2] sm:$0xff] }
  0xaa   :  { %v206_v16 = vpop.f32.mrf.mxu1  ;;  %307 = vst.msk [vmem:[#allocation2 + $0x8] sm:$0xf] %vm302_vm1, %v169_v28 }
  0xab   :  { %v207_v18 = vadd.f32 %v558_v11, %v206_v16 }
  0xad   :  { %v163_v29 = vpop.f32.mrf.mxu0 }
  0xae   :  { %v164_v31 = vadd.f32 %v559_v22, %v163_v29 }
  0xb0   :  { %v170_v33 = vpack.c.bf16 %v164_v31, %v164_v31 }
  0xb1   :  { %v312_v2 = vld [vmem:[#allocation2 + $0x8] sm:$0xf] }
  0xb2   :  { %v208_v17 = vpop.f32.mrf.mxu1  ;;  %308 = vst.msk [vmem:[#allocation2 + $0x10] sm:$0xf] %vm302_vm1, %v170_v33  ;;  %v321_v5 = vunpack.c.l.b16 %v312_v2 }
  0xb3   :  { %v209_v19 = vadd.f32 %v558_v11, %v208_v17 }
  0xb4   :  { %v323_v7 = vpack.c.b16 %v321_v5, %v321_v5 }
  0xb5   :  { %v212_v20 = vpack.c.bf16 %v209_v19, %v207_v18  ;;  %v165_v30 = vpop.f32.mrf.mxu0 }
  0xb6   :  { %v166_v32 = vadd.f32 %v559_v22, %v165_v30 }
  0xb7   :  { %506 = vmatmul.msk.bf16.gmra.mxu2 %vm142_vm0, %v212_v20  ;;  %516 = vmatmul.msk.bf16.gmra.mxu3 %vm142_vm0, %v212_v20 }
  0xb8   :  { %v171_v34 = vpack.c.bf16 %v166_v32, %v166_v32 }
  0xb9   :  { %v550_v6 = vld [vmem:[#allocation2 + $0xc] sm:$0xff] }
  0xba   :  { %309 = vst.msk [vmem:[#allocation2 + $0x14] sm:$0xf] %vm302_vm1, %v171_v34 }
  0xc1   :  { %v315_v8 = vld [vmem:[#allocation2 + $0x14] sm:$0xf] }
  0xc2   :  { %v361_v9 = vunpack.c.l.b16 %v315_v8 }
  0xc4   :  { %v363_v10 = vpack.c.b16 %v361_v9, %v361_v9 }
 0x12a   :  { %v244_v35 = vpop.f32.mrf.mxu2  ;;  %v283_v36 = vpop.f32.mrf.mxu3 }
 0x12b   :  { %v254_v37 = vpack.c.bf16 %v244_v35, %v244_v35  ;;  %v293_v38 = vpack.c.bf16 %v283_v36, %v283_v36 }
 0x12d   :  { %v326_v43 = vunpack.c.l.b16 %v254_v37  ;;  %v405_v44 = vunpack.c.l.b16 %v293_v38 }
 0x132   :  { %v246_v39 = vpop.f32.mrf.mxu2  ;;  %v285_v40 = vpop.f32.mrf.mxu3 }
 0x133   :  { %v255_v41 = vpack.c.bf16 %v246_v39, %v246_v39  ;;  %v294_v42 = vpack.c.bf16 %v285_v40, %v285_v40 }
 0x135   :  { %v327_v45 = vunpack.c.l.b16 %v255_v41  ;;  %v406_v46 = vunpack.c.l.b16 %v294_v42 }
 0x137   :  { %v328_v47 = vpack.c.b16 %v327_v45, %v326_v43  ;;  %v407_v48 = vpack.c.b16 %v406_v46, %v405_v44 }
 0x139   :  { %v336_v49 = vsel %vm142_vm0, %v328_v47, 0  ;;  %v409_v50 = vsel %vm142_vm0, %v407_v48, 0 }
 0x13a   :  { %v249_v51 = vpop.f32.mrf.mxu2  ;;  %v288_v52 = vpop.f32.mrf.mxu3  ;;  %345 = vmatpush.bf16.xpose.msrb.mxu0 %v336_v49  ;;  %418 = vmatpush.bf16.xpose.msrb.mxu2 %v409_v50 }
 0x13b   :  { %v256_v54 = vpack.c.bf16 %v249_v51, %v249_v51  ;;  %v295_v55 = vpack.c.bf16 %v288_v52, %v288_v52 }
 0x13d   :  { %v366_v60 = vunpack.c.l.b16 %v256_v54  ;;  %v431_v61 = vunpack.c.l.b16 %v295_v55 }
 0x141   :  { %521 = vmatmul.msk.bf16.vlgmr.msrb.gmra.mxu0 %vm142_vm0, %v549_v53  ;;  %529 = vmatmul.msk.bf16.vlgmr.msrb.gmra.mxu2 %vm142_vm0, %v549_v53 }
 0x142   :  { %v251_v56 = vpop.f32.mrf.mxu2  ;;  %v290_v57 = vpop.f32.mrf.mxu3 }
 0x143   :  { %v257_v58 = vpack.c.bf16 %v251_v56, %v251_v56  ;;  %v296_v59 = vpack.c.bf16 %v290_v57, %v290_v57 }
 0x145   :  { %v367_v62 = vunpack.c.l.b16 %v257_v58  ;;  %v432_v63 = vunpack.c.l.b16 %v296_v59 }
 0x147   :  { %v368_v0 = vpack.c.b16 %v367_v62, %v366_v60  ;;  %v433_v1 = vpack.c.b16 %v432_v63, %v431_v61 }
 0x149   :  { %v376_v3 = vsel %vm142_vm0, %v368_v0, 0  ;;  %v435_v4 = vsel %vm142_vm0, %v433_v1, 0 }
 0x14a   :  { %385 = vmatpush.bf16.xpose.msrb.mxu1 %v376_v3  ;;  %444 = vmatpush.bf16.xpose.msrb.mxu3 %v435_v4 }
 0x151   :  { %522 = vmatmul.msk.bf16.gmra.mxu0 %vm142_vm0, %v323_v7  ;;  %527 = vmatmul.msk.bf16.vlgmr.msrb.gmra.mxu1 %vm142_vm0, %v550_v6 }
 0x152   :  { %530 = vmatmul.msk.bf16.gmra.mxu2 %vm142_vm0, %v323_v7  ;;  %531 = vmatmul.msk.bf16.vlgmr.msrb.gmra.mxu3 %vm142_vm0, %v550_v6 }
 0x161   :  { %528 = vmatmul.msk.bf16.gmra.mxu1 %vm142_vm0, %v363_v10 }
 0x162   :  { %532 = vmatmul.msk.bf16.gmra.mxu3 %vm142_vm0, %v363_v10 }
 0x1be   :  { %v347_v11 = vpop.f32.mrf.mxu0 }
 0x1bf   :  { %397 = vst.msk [vmem:[%s838_s8] sm:$0xff] %vm396_vm2, %v347_v11 }
 0x1c4   :  { %v420_v12 = vpop.f32.mrf.mxu2 }
 0x1c5   :  { %533 = vst.msk [vmem:[%s838_s8 + $0x18] sm:$0xff] %vm396_vm2, %v420_v12 }
 0x1c6   :  { %v349_v13 = vpop.f32.mrf.mxu0 }
 0x1c7   :  { %398 = vst.msk [vmem:[%s838_s8 + $0x8] sm:$0xff] %vm396_vm2, %v349_v13 }
 0x1cc   :  { %v422_v14 = vpop.f32.mrf.mxu2 }
 0x1cd   :  { %534 = vst.msk [vmem:[%s838_s8 + $0x20] sm:$0xff] %vm396_vm2, %v422_v14 }
 0x1ce   :  { %v352_v15 = vpop.f32.mrf.mxu0  ;;  %v387_v16 = vpop.f32.mrf.mxu1 }
 0x1cf   :  { %399 = vst.msk [vmem:[%s838_s8 + $0x10] sm:$0xff] %vm396_vm2, %v352_v15 }
 0x1d0   :  { %400 = vst.msk [vmem:[%s838_s8 + $0x30] sm:$0xff] %vm396_vm2, %v387_v16 }
 0x1d5   :  { %v425_v17 = vpop.f32.mrf.mxu2  ;;  %v446_v18 = vpop.f32.mrf.mxu3 }
 0x1d6   :  { %535 = vst.msk [vmem:[%s838_s8 + $0x28] sm:$0xff] %vm396_vm2, %v425_v17  ;;  %v354_v19 = vpop.f32.mrf.mxu0  ;;  %v389_v20 = vpop.f32.mrf.mxu1 }
 0x1d7   :  { %536 = vst.msk [vmem:[%s838_s8 + $0x48] sm:$0xff] %vm396_vm2, %v446_v18 }
 0x1d8   :  { %401 = vst.msk [vmem:[%s838_s8 + $0x38] sm:$0xff] %vm396_vm2, %v389_v20 }
 0x1dd   :  { %v427_v21 = vpop.f32.mrf.mxu2  ;;  %v448_v22 = vpop.f32.mrf.mxu3 }
 0x1de   :  { %537 = vst.msk [vmem:[%s838_s8 + $0x50] sm:$0xff] %vm396_vm2, %v448_v22  ;;  %v392_v23 = vpop.f32.mrf.mxu1 }
 0x1df   :  { %402 = vst.msk [vmem:[%s838_s8 + $0x40] sm:$0xff] %vm396_vm2, %v392_v23 }
 0x1e5   :  { %v451_v24 = vpop.f32.mrf.mxu3 }
 0x1e6   :  { %538 = vst.msk [vmem:[%s838_s8 + $0x58] sm:$0xff] %vm396_vm2, %v451_v24  ;;  %v394_v25 = vpop.f32.mrf.mxu1 }
 0x1ed   :  { %v453_v26 = vpop.f32.mrf.mxu3 }
 0x1ee   :  { %466 = vsyncpa [#allocation4], 1 }
 0x1ef   :  { %467 = vsyncpa [#allocation6], 1 }
 0x1f0   :  { %468 = vsyncpa [#allocation9], 1 }

</bundles_post_ra>
